<compile_context>
chip_gen: v7x
topology: tpu7x:2x2x1
jax: 0.10.0
libtpu: 0.0.40
codegen_flags: <defaults>
</compile_context>

<pallas_src>
import functools

import jax
import jax.numpy as jnp
from jax import lax
from jax.experimental import pallas as pl
from jax.experimental.pallas import tpu as pltpu

IN_DIM = 3        # state = (3,) in the original module
HID_DIM = 20
OUT_DIM = 3       # len(actions_enum)

DEFAULT_BATCH_TILE = 64 * 1024    # lanes per grid step
MAX_BATCH_TILE = 256 * 1024       # hard cap so I/O buffers fit every generation
LANE_CHUNK = 512                  # inner chunk: [20, 512] f32 h stays in vregs


def _round_up(n, m):
    return ((n + m - 1) // m) * m


def _choose_tile(batch, batch_tile):
    """Pick a lane tile (multiple of 128) and the padded batch size."""
    batch_tile = max(128, min(int(batch_tile), MAX_BATCH_TILE))
    tb = _round_up(batch_tile, 128)               # always a multiple of 128
    b128 = _round_up(max(batch, 1), 128)
    tb = min(tb, b128)
    # Keep >= 2 grid steps when the batch allows it so ("parallel",) can
    # distribute batch tiles over both v7x TensorCores.
    if b128 >= 256 and (b128 + tb - 1) // tb < 2:
        tb = _round_up((b128 + 1) // 2, 128)
    padded = _round_up(batch, tb)
    return tb, padded


def _chunk_for(tb):
    """Largest inner lane-chunk (<= LANE_CHUNK) that divides the tile."""
    for c in (LANE_CHUNK, 256, 128):
        if c <= tb and tb % c == 0:
            return c
    return tb


def _atc_net_kernel(x_ref, w1_ref, b1_ref, w2_ref, b2_ref, o_ref, *, chunk):
    """Fused MLP in transposed (lane-dense) layout.

    x_ref : [IN_DIM,  TB]   batch on lanes
    w1_ref: [HID_DIM, IN_DIM]   (fcInp weight, PyTorch layout)
    b1_ref: [HID_DIM, 1]
    w2_ref: [OUT_DIM, HID_DIM]  (fcOut weight, PyTorch layout)
    b2_ref: [OUT_DIM, 1]
    o_ref : [OUT_DIM, TB]

    out = W2 @ relu(W1 @ x + b1) + b2   (== fcOut(relu(fcInp(x))))
    """
    w1 = w1_ref[...]                                            # [20, 3]
    w2 = w2_ref[...]                                            # [3, 20]
    # Hoist bias broadcasts out of the loop (JAX does not CSE broadcast_in_dim).
    b1 = jnp.broadcast_to(b1_ref[...], (HID_DIM, chunk))        # [20, chunk]
    b2 = jnp.broadcast_to(b2_ref[...], (OUT_DIM, chunk))        # [3, chunk]

    n_chunks = x_ref.shape[-1] // chunk

    def body(c, carry):
        start = pl.multiple_of(c * chunk, chunk)
        x = x_ref[:, pl.ds(start, chunk)]                       # [3, chunk]
        h = jnp.dot(w1, x, preferred_element_type=jnp.float32) + b1
        h = jnp.maximum(h, 0.0)                                 # stays in vregs
        y = jnp.dot(w2, h, preferred_element_type=jnp.float32) + b2
        o_ref[:, pl.ds(start, chunk)] = y.astype(o_ref.dtype)
        return carry

    lax.fori_loop(0, n_chunks, body, 0)


def atc_net_forward_fm(x_fm, w1, b1, w2, b2, *, batch_tile=DEFAULT_BATCH_TILE):
    """Fast path: feature-major activations end-to-end (no transposes).

    x_fm: [IN_DIM, B] f32  ->  [OUT_DIM, B] f32
    w1: [HID_DIM, IN_DIM], b1: [HID_DIM], w2: [OUT_DIM, HID_DIM], b2: [OUT_DIM]
    (PyTorch nn.Linear weight layout.)
    """
    in_dim, B = x_fm.shape
    assert in_dim == IN_DIM, f"expected leading dim {IN_DIM}, got {in_dim}"

    tb, Bp = _choose_tile(B, batch_tile)
    chunk = _chunk_for(tb)

    if Bp != B:
        x_fm = jnp.pad(x_fm, ((0, 0), (0, Bp - B)))

    b1c = b1.reshape(HID_DIM, 1).astype(jnp.float32)
    b2c = b2.reshape(OUT_DIM, 1).astype(jnp.float32)

    # Double-buffered x + out blocks: (3, tb) pads to 8 sublanes in VMEM.
    io_bytes = 2 * (2 * 8 * tb * 4)
    vmem_limit = int(min(max(io_bytes + (2 << 20), 16 << 20), 64 << 20))

    grid = (Bp // tb,)

    out_fm = pl.pallas_call(
        functools.partial(_atc_net_kernel, chunk=chunk),
        out_shape=jax.ShapeDtypeStruct((OUT_DIM, Bp), jnp.float32),
        grid_spec=pltpu.PrefetchScalarGridSpec(
            num_scalar_prefetch=0,
            grid=grid,
            in_specs=[
                # x: new batch tile each grid step (auto double-buffered).
                pl.BlockSpec((IN_DIM, tb), lambda i: (0, i)),
                # weights/biases: constant index -> DMA'd once, stay resident.
                pl.BlockSpec((HID_DIM, IN_DIM), lambda i: (0, 0)),
                pl.BlockSpec((HID_DIM, 1), lambda i: (0, 0)),
                pl.BlockSpec((OUT_DIM, HID_DIM), lambda i: (0, 0)),
                pl.BlockSpec((OUT_DIM, 1), lambda i: (0, 0)),
            ],
            out_specs=pl.BlockSpec((OUT_DIM, tb), lambda i: (0, i)),
        ),
        compiler_params=pltpu.CompilerParams(
            dimension_semantics=("parallel",),   # shard batch tiles across TCs
            vmem_limit_bytes=vmem_limit,
        ),
    )(x_fm, w1, b1c, w2, b2c)

    if Bp != B:
        out_fm = out_fm[:, :B]
    return out_fm


def atc_net_forward(x, w1, b1, w2, b2, *, batch_tile=DEFAULT_BATCH_TILE):
    """PyTorch-layout convenience wrapper: x [B, 3] (or [3]) -> [B, 3] (or [3]).

    NOTE: pays two XLA transpose passes around the kernel; for large batches
    prefer atc_net_forward_fm and keep activations feature-major end-to-end.
    """
    squeeze = x.ndim == 1
    if squeeze:
        x = x[None, :]
    out = atc_net_forward_fm(x.T, w1, b1, w2, b2, batch_tile=batch_tile).T
    return out[0] if squeeze else out


def init_params(key):
    """nn.Linear-style init U[-1/sqrt(fan_in), +1/sqrt(fan_in)], PyTorch layout."""
    k1, k2, k3, k4 = jax.random.split(key, 4)
    bound1 = 1.0 / jnp.sqrt(jnp.float32(IN_DIM))
    bound2 = 1.0 / jnp.sqrt(jnp.float32(HID_DIM))
    w1 = jax.random.uniform(k1, (HID_DIM, IN_DIM), jnp.float32, -bound1, bound1)
    b1 = jax.random.uniform(k2, (HID_DIM,), jnp.float32, -bound1, bound1)
    w2 = jax.random.uniform(k3, (OUT_DIM, HID_DIM), jnp.float32, -bound2, bound2)
    b2 = jax.random.uniform(k4, (OUT_DIM,), jnp.float32, -bound2, bound2)
    return w1, b1, w2, b2


def reference_forward(x, w1, b1, w2, b2):
    # PyTorch semantics: y = x @ W.T + b
    h = jnp.maximum(x @ w1.T + b1, 0.0)
    return h @ w2.T + b2


# TODO(synk): the Buffer / learn() / Adam training loop of CR_2AC.py is host-side
# RL bookkeeping with no Pallas equivalent; only forward() is implemented here.

if __name__ == "__main__":
    key = jax.random.PRNGKey(0)
    kx, kp = jax.random.split(key)

    w1, b1, w2, b2 = init_params(kp)

    # 1) Small batch, PyTorch layout.
    batch = 8
    x = jax.random.normal(kx, (batch, IN_DIM), jnp.float32)
    out = jax.block_until_ready(atc_net_forward(x, w1, b1, w2, b2))
    ref = reference_forward(x, w1, b1, w2, b2)
    assert out.shape == (batch, OUT_DIM)
    assert jnp.allclose(out, ref, atol=1e-5, rtol=1e-5), "mismatch vs reference"

    # 2) Batch spanning multiple grid steps + non-multiple-of-128 batch_tile
    #    (exercises the tb rounding fix and batch padding).
    batch2 = 300
    x2 = jax.random.normal(kx, (batch2, IN_DIM), jnp.float32)
    out2 = jax.block_until_ready(
        atc_net_forward(x2, w1, b1, w2, b2, batch_tile=200))
    ref2 = reference_forward(x2, w1, b1, w2, b2)
    assert out2.shape == (batch2, OUT_DIM)
    assert jnp.allclose(out2, ref2, atol=1e-5, rtol=1e-5), "mismatch (tiled)"

    # 3) Feature-major fast path (no wrapper transposes).
    out3 = jax.block_until_ready(atc_net_forward_fm(x2.T, w1, b1, w2, b2))
    assert out3.shape == (OUT_DIM, batch2)
    assert jnp.allclose(out3.T, ref2, atol=1e-5, rtol=1e-5), "mismatch (fm path)"

    # 4) Single state vector, as the RL agent calls forward(state).
    s = jax.random.normal(kx, (IN_DIM,), jnp.float32)
    outs = jax.block_until_ready(atc_net_forward(s, w1, b1, w2, b2))
    refs = reference_forward(s[None, :], w1, b1, w2, b2)[0]
    assert outs.shape == (OUT_DIM,)
    assert jnp.allclose(outs, refs, atol=1e-5, rtol=1e-5), "mismatch (single state)"

    print("KERNEL_OK")
</pallas_src>

<mosaic_0001>
module attributes {stable_mosaic.version = 11 : i64} {
  func.func @_atc_net_kernel(%arg0: i32, %arg1: memref<3x128xf32, #tpu.memory_space<vmem>>, %arg2: memref<20x3xf32, #tpu.memory_space<vmem>>, %arg3: memref<20x1xf32, #tpu.memory_space<vmem>>, %arg4: memref<3x20xf32, #tpu.memory_space<vmem>>, %arg5: memref<3x1xf32, #tpu.memory_space<vmem>>, %arg6: memref<3x128xf32, #tpu.memory_space<vmem>>) attributes {dimension_semantics = [#tpu.dimension_semantics<parallel>], iteration_bounds = array<i64: 1>, scalar_prefetch = 0 : i64, scratch_operands = 0 : i64, tpu.core_type = #tpu.core_type<tc>, window_params = [{transform_indices = @transform_0, window_bounds = array<i64: 3, 128>}, {pipeline_mode = #tpu.pipeline_mode<synchronous>, transform_indices = @transform_1, window_bounds = array<i64: 20, 3>}, {pipeline_mode = #tpu.pipeline_mode<synchronous>, transform_indices = @transform_2, window_bounds = array<i64: 20, 1>}, {pipeline_mode = #tpu.pipeline_mode<synchronous>, transform_indices = @transform_3, window_bounds = array<i64: 3, 20>}, {pipeline_mode = #tpu.pipeline_mode<synchronous>, transform_indices = @transform_4, window_bounds = array<i64: 3, 1>}, {transform_indices = @transform_5, window_bounds = array<i64: 3, 128>}]} {
    %c0 = arith.constant 0 : index
    %c0_0 = arith.constant 0 : index
    %0 = vector.load %arg2[%c0, %c0_0] : memref<20x3xf32, #tpu.memory_space<vmem>>, vector<20x3xf32>
    %c0_1 = arith.constant 0 : index
    %c0_2 = arith.constant 0 : index
    %1 = vector.load %arg4[%c0_1, %c0_2] : memref<3x20xf32, #tpu.memory_space<vmem>>, vector<3x20xf32>
    %c0_3 = arith.constant 0 : index
    %c0_4 = arith.constant 0 : index
    %2 = vector.load %arg3[%c0_3, %c0_4] : memref<20x1xf32, #tpu.memory_space<vmem>>, vector<20x1xf32>
    %3 = vector.shape_cast %2 : vector<20x1xf32> to vector<20x1xf32>
    %4 = vector.broadcast %3 : vector<20x1xf32> to vector<20x128xf32>
    %c0_5 = arith.constant 0 : index
    %c0_6 = arith.constant 0 : index
    %5 = vector.load %arg5[%c0_5, %c0_6] : memref<3x1xf32, #tpu.memory_space<vmem>>, vector<3x1xf32>
    %6 = vector.shape_cast %5 : vector<3x1xf32> to vector<3x1xf32>
    %7 = vector.broadcast %6 : vector<3x1xf32> to vector<3x128xf32>
    %c0_i32 = arith.constant 0 : i32
    %c128_i32 = arith.constant 128 : i32
    %8 = arith.muli %c0_i32, %c128_i32 : i32
    %9 = tpu.assume_multiple %8, 128 : i32
    %c0_7 = arith.constant 0 : index
    %10 = arith.index_cast %9 : i32 to index
    %11 = vector.load %arg1[%c0_7, %10] : memref<3x128xf32, #tpu.memory_space<vmem>>, vector<3x128xf32>
    %cst = arith.constant dense<0.000000e+00> : vector<20x128xf32>
    %12 = tpu.matmul %0, %11, %cst {dimension_numbers = #tpu.dot_dimension_numbers<[1], [0], [0], [1], [0, 0, 1, 1], [], []>} : vector<20x3xf32>, vector<3x128xf32>, vector<20x128xf32> -> vector<20x128xf32>
    %13 = arith.addf %12, %4 : vector<20x128xf32>
    %cst_8 = arith.constant 0.000000e+00 : f32
    %14 = vector.broadcast %cst_8 : f32 to vector<20x128xf32>
    %15 = arith.maximumf %13, %14 : vector<20x128xf32>
    %cst_9 = arith.constant dense<0.000000e+00> : vector<3x128xf32>
    %16 = tpu.matmul %1, %15, %cst_9 {dimension_numbers = #tpu.dot_dimension_numbers<[1], [0], [0], [1], [0, 0, 1, 1], [], []>} : vector<3x20xf32>, vector<20x128xf32>, vector<3x128xf32> -> vector<3x128xf32>
    %17 = arith.addf %16, %7 : vector<3x128xf32>
    %c0_10 = arith.constant 0 : index
    %18 = arith.index_cast %9 : i32 to index
    %19 = vector.load %arg6[%c0_10, %18] : memref<3x128xf32, #tpu.memory_space<vmem>>, vector<3x128xf32>
    tpu.vector_store %arg6[%c0_10, %18], %17 {strides = array<i32>} : memref<3x128xf32, #tpu.memory_space<vmem>>, vector<3x128xf32>,
    %c1_i32 = arith.constant 1 : i32
    return
  }
  func.func @transform_0(%arg0: i32) -> (i32, i32) {
    %c0_i32 = arith.constant 0 : i32
    %c0_i32_0 = arith.constant 0 : i32
    return %c0_i32, %arg0 : i32, i32
  }
  func.func @transform_1(%arg0: i32) -> (i32, i32) {
    %c0_i32 = arith.constant 0 : i32
    %c0_i32_0 = arith.constant 0 : i32
    %c0_i32_1 = arith.constant 0 : i32
    return %c0_i32, %c0_i32_0 : i32, i32
  }
  func.func @transform_2(%arg0: i32) -> (i32, i32) {
    %c0_i32 = arith.constant 0 : i32
    %c0_i32_0 = arith.constant 0 : i32
    %c0_i32_1 = arith.constant 0 : i32
    return %c0_i32, %c0_i32_0 : i32, i32
  }
  func.func @transform_3(%arg0: i32) -> (i32, i32) {
    %c0_i32 = arith.constant 0 : i32
    %c0_i32_0 = arith.constant 0 : i32
    %c0_i32_1 = arith.constant 0 : i32
    return %c0_i32, %c0_i32_0 : i32, i32
  }
  func.func @transform_4(%arg0: i32) -> (i32, i32) {
    %c0_i32 = arith.constant 0 : i32
    %c0_i32_0 = arith.constant 0 : i32
    %c0_i32_1 = arith.constant 0 : i32
    return %c0_i32, %c0_i32_0 : i32, i32
  }
  func.func @transform_5(%arg0: i32) -> (i32, i32) {
    %c0_i32 = arith.constant 0 : i32
    %c0_i32_0 = arith.constant 0 : i32
    return %c0_i32, %arg0 : i32, i32
  }
}

</mosaic_0001>

<bundles_post_ra>
// kernel: tpu_custom_call.1
= control target key start
LH: loop header
LB: loop body
LE: loop exit
PB: predicated region body
PF: predicated region fallthrough
CT: control target
= control target key end

     0   :  { %vm60_vm0 = vcmask 1042432   ;;  %v308_v2 = vmov 0.0   ;;  %vm309_vm1 = vmmov 0   ;;  %vm50_vm2 = vcmask 23552   ;;  %s389_s0 = inlined_call_operand.vmem [shape: f32[3,128], index: 0, kind: input, shape index: {}]   ;;  %s390_s1 = inlined_call_operand.vmem [shape: f32[20,3], index: 1, kind: input, shape index: {}]   ;;  %s391_s2 = inlined_call_operand.vmem [shape: f32[20,1], index: 2, kind: input, shape index: {}]   ;;  %s392_s3 = inlined_call_operand.vmem [shape: f32[3,20], index: 3, kind: input, shape index: {}]   ;;  %s393_s4 = inlined_call_operand.vmem [shape: f32[3,1], index: 4, kind: input, shape index: {}]   ;;  %s394_s5 = inlined_call_operand.hbm [shape: f32[3,128], index: 5, kind: output, shape index: {}]  }
   0x1   :  { %v49_v0 = vld [vmem:[%s389_s0] sm:$0x7]  ;;  %254 = vmatprep.subr.mxu0 %v308_v2  ;;  %256 = vmatprep.mubr.msk.f32.mxu0 %vm309_vm1, %v308_v2  ;;  %v310_v4 = vmov 0   ;;  %v27_v5 = vld [vmem:[%s391_s2 + $0x10] sm:$0xf] }
   0x2   :  { %v21_v1 = vld [vmem:[%s390_s1] sm:$0xff]  ;;  %255 = vmatpush3.msk.msra.mxu0 %vm60_vm0, %v49_v0  ;;  %282 = vset.pattern.permute.xlu0 %v310_v4 }
   0x3   :  { %v25_v3 = vld [vmem:[%s391_s2] sm:$0xff]  ;;  %257 = vmatmul.mubr.msk.f32.vlgmr.msra.gmra.mrb[0].mxu0 %vm50_vm2, %v21_v1 }
   0x4   :  { %30 = vperm.xlu0 %282, %v25_v3  }
   0x5   :  { %10 = vsyncpa [#allocation3], 0  ;;  %259 = vmatprep.mubr.msk.f32.mxu0 %vm309_vm1, %v308_v2  ;;  %v22_v6 = vld [vmem:[%s390_s1 + $0x8] sm:$0xff]  ;;  %283 = vset.pattern.permute.xlu1 %v310_v4  ;;  %v43_v8 = vld [vmem:[%s393_s4] sm:$0x7]  ;;  %v311_v10 = vmov 0.0|0.0  }
   0x6   :  { %v26_v7 = vld [vmem:[%s391_s2 + $0x8] sm:$0xff]  ;;  %40 = vperm.xlu1 %283, %v27_v5   ;;  %271 = vmatprep.mubr.msk.f32.mxu1 %vm309_vm1, %v308_v2  ;;  %v23_v9 = vld [vmem:[%s390_s1 + $0x10] sm:$0xf]  ;;  %vm151_vm3 = vcmask 1043456   ;;  %v24_v27 = vld [vmem:[%s392_s3] sm:$0x7] }
   0x7   :  { %260 = vmatmul.mubr.msk.f32.gmra.mrb[2].mxu0 %vm50_vm2, %v22_v6  ;;  %274 = vmatprep.subr.bf16.mxu1 %v311_v10  ;;  %vm147_vm4 = vcmask 162816   ;;  %s312_s4 = smov [#allocation2]  }
   0x8   :  { %35 = vperm.xlu0 %282, %v26_v7   ;;  %262 = vmatprep.mubr.msk.f32.mxu0 %vm309_vm1, %v308_v2  ;;  %s232_s8 = sshll.u32 %s312_s4, 4  ;;  %s233_s8 = int_to_ptr.vmem [resolvable:$true] %s232_s8 }
   0x9   :  { %s284_s9 = scalar_lea.vmem %s233_s8, 64  ;;  %p289_p1 = scmp.lt.s32.totalorder %s233_s8, %s233_s8 }
   0xa   :  { %46 = vperm.xlu1 %283, %v43_v8   ;;  %p285_p0 = scmp.ne.s32.totalorder %s233_s8, %s284_s9  ;;  %p290_p2 = scmp.lt.s32.totalorder %s284_s9, %s284_s9 }
   0xb   :  { %263 = vmatmul.mubr.msk.f32.gmra.mrb[4].mxu0 %vm50_vm2, %v23_v9 }
   0xc   :  { %p291_p3 = por %p290_p2, %p289_p1 }
   0xe   :  { %p292_p4 = pnand %p291_p3, %p285_p0 }
  0x83   :  { %v31_v11 = vpop.permute.xlu0 %30 }
  0x85   :  { %v41_v21 = vpop.permute.xlu1 %40 }
  0x87   :  { %v36_v15 = vpop.permute.xlu0 %35 }
  0x89   :  { %v47_v28 = vpop.permute.xlu1 %46 }
  0xd6   :  { %v130_v12 = vpop.f32.mrb[0].mxu0 }
  0xd7   :  { %v258_v13 = vpop.f32.mrb[1].mxu0  ;;  %v131_v14 = vadd.f32 %v130_v12, %v31_v11 }
  0xd9   :  { %v144_v19 = vmax.f32 %v131_v14, 0.0 }
  0xda   :  { %v135_v16 = vpop.f32.mrb[2].mxu0 }
  0xdb   :  { %v136_v17 = vadd.f32 %v135_v16, %v36_v15  ;;  %v261_v18 = vpop.f32.mrb[3].mxu0 }
  0xdd   :  { %v145_v20 = vmax.f32 %v136_v17, 0.0 }
  0xde   :  { %v140_v22 = vpop.f32.mrb[4].mxu0 }
  0xdf   :  { %v141_v23 = vadd.f32 %v140_v22, %v41_v21  ;;  %v264_v24 = vpop.f32.mrb[5].mxu0  ;;  %v275_v25 = vpack.c.bf16 %v145_v20, %v144_v19 }
  0xe1   :  { %v146_v26 = vmax.f32 %v141_v23, 0.0  ;;  %276 = vmatpush3.bf16.msra.mxu1 %v275_v25 }
  0xe2   :  { %269 = vmatprep.subr.mxu1 %v308_v2 }
  0xe5   :  { %270 = vmatpush3.msk.msra.mxu1 %vm151_vm3, %v146_v26 }
  0xe6   :  { %272 = vmatmul.mubr.msk.f32.vlgmr.msra.gmra.mrb[0].mxu1 %vm147_vm4, %v24_v27 }
 0x1b9   :  { %v221_v29 = vpop.f32.mrb[0].mxu1 }
 0x1ba   :  { %v222_v30 = vadd.f32 %v221_v29, %v47_v28  ;;  %v273_v31 = vpop.f32.mrb[1].mxu1 }
 0x1bc   :  { %225 = vst [vmem:[#allocation2] sm:$0x7] %v222_v30 }
 0x1bd   :  { %295 = shalt.err (!%p292_p4)
}
 0x1be   :  { %s296_s11 = scalar_lea.hbm %s394_s5, 64 }
 0x1bf   :  { %p297_p5 = scmp.ne.s32.totalorder %s394_s5, %s296_s11  ;;  %p300_p6 = scmp.lt.u32.totalorder %s296_s11, %s394_s5 }
 0x1c1   :  { %p302_p7 = pnand %p300_p6, %p297_p5 }
 0x1c3   :  { %305 = shalt.err (!%p302_p7)
}
 0x1c4   :  { %235 = dma.vmem_to_hbm [thread:$0]  %s233_s8, 64, %s394_s5, [#allocation3]  }
 0x1c5   :  { %306 = dma.done.wait [#allocation3], 64  }
 0x1c6   :  { %307 = vsyncadd [#allocation3], 4294967232 }
 0x1c7   :  { %239 = vsyncpa [#allocation3], 1 }

</bundles_post_ra>
